<compile_context>
chip_gen: v5e
topology: v5e:2x2
jax: 0.10.0
libtpu: 0.0.40
codegen_flags: <defaults>
</compile_context>

<pallas_src>
import functools

import jax
import jax.numpy as jnp
from jax.experimental import pallas as pl
from jax.experimental.pallas import tpu as pltpu


def _round_up(v, m):
    return ((v + m - 1) // m) * m


def _vmem_capacity_bytes():
    """Physical VMEM of the local TPU generation; conservative fallback."""
    try:
        cap = int(getattr(pltpu.get_tpu_info(), "vmem_capacity_bytes", 0) or 0)
        if cap > 0:
            return cap
    except Exception:
        pass
    return 64 << 20  # v7x per-core size: safe lower bound for all generations


def _legal_tn(limit, n):
    """Largest batch tile <= limit that is legal as a second-minor output block
    dim: equal to the full dim `n` or a multiple of 8.  Returns 0 if none."""
    if limit >= n:
        return n
    if limit >= 8:
        return (limit // 8) * 8
    return 0


def _select_plan(n, c1, hw, itemsize, budget):
    """Pick a streaming strategy and tile sizes given a per-x-buffer byte budget.

    Returns (plan, tn, chunk):
      "full": x block (tn, c1, hw), chunk=None
      "c1":   x block (tn, chunk, hw)  (chunk = TC1, reduce over channel chunks)
      "hw":   x block (tn, c1, chunk)  (chunk = THW, reduce over spatial chunks)
    """
    sublane = max(8, 32 // itemsize)          # f32: 8, bf16: 16, int8: 32
    lanes_hw = _round_up(hw, 128)
    c1_sub = _round_up(c1, sublane)

    # --- "full": whole images per block -> one-step reduction, best DMA shape.
    per_img = c1_sub * lanes_hw * itemsize
    tn = _legal_tn(budget // max(per_img, 1), n)
    if tn > 0:
        tn = min(tn, 256)                     # bound epilogue matmul / out block
        if n >= 16:                           # keep >= 2 parallel tiles (v7x dual-TC)
            cap = _legal_tn(-(-n // 2), n)
            if cap >= 8:
                tn = min(tn, cap)
        return "full", tn, None

    # --- "c1": full-HW rows, chunk the channels (contiguous runs of tc1*hw).
    tn = n if n < 8 else 8
    per_chan = tn * lanes_hw * itemsize
    max_tc1 = budget // max(per_chan, 1)
    if max_tc1 >= sublane:
        tc1 = min((max_tc1 // sublane) * sublane, c1)
        return "c1", tn, tc1

    # --- "hw": chunk the spatial axis (only for extremely large H*W).
    max_thw = budget // max(tn * c1_sub * itemsize, 1)
    thw = max(128, (max_thw // 128) * 128)
    if thw >= hw:
        thw = hw
    return "hw", tn, thw


# ----------------------------- kernels ------------------------------------ #


def _classify_full_kernel(x_ref, w_ref, b_ref, o_ref):
    # x_ref: (TN, C1, HW); w_ref: (C1, C2p) already scaled by 1/HW; b_ref: (1, C2p)
    pooled = jnp.sum(x_ref[...], axis=-1, dtype=jnp.float32)          # (TN, C1)
    out = jnp.dot(pooled, w_ref[...], preferred_element_type=jnp.float32)
    o_ref[...] = (out + b_ref[...]).astype(o_ref.dtype)


def _classify_c1_kernel(x_ref, w_ref, b_ref, o_ref, acc_ref, *, c1, tc1, needs_mask):
    # x_ref: (TN, TC1, HW); w_ref: (TC1, C2p) chunk of the 1/HW-scaled weight.
    j = pl.program_id(1)
    nj = pl.num_programs(1)

    @pl.when(j == 0)
    def _init():
        acc_ref[...] = jnp.zeros_like(acc_ref)

    pooled = jnp.sum(x_ref[...], axis=-1, dtype=jnp.float32)          # (TN, TC1)
    if needs_mask:
        # Zero the channel columns past C1 in the (partial) last block; the
        # matching weight rows are real zeros (padded in the wrapper), so any
        # garbage from the padded region of the x block is killed.
        ch = jax.lax.broadcasted_iota(jnp.int32, pooled.shape, dimension=1)
        pooled = jnp.where(ch + j * tc1 < c1, pooled, 0.0)
    acc_ref[...] += jnp.dot(pooled, w_ref[...], preferred_element_type=jnp.float32)

    @pl.when(j == nj - 1)
    def _epilogue():
        o_ref[...] = (acc_ref[...] + b_ref[...]).astype(o_ref.dtype)


def _classify_hw_kernel(x_ref, w_ref, b_ref, o_ref, acc_ref, *, hw, thw, needs_mask):
    # x_ref: (TN, C1, THW); mask the padded spatial tail only on the last chunk.
    k = pl.program_id(1)
    nk = pl.num_programs(1)

    @pl.when(k == 0)
    def _init():
        acc_ref[...] = jnp.zeros_like(acc_ref)

    def _accum(mask_tail):
        x = x_ref[...].astype(jnp.float32)
        if mask_tail:
            col = jax.lax.broadcasted_iota(jnp.int32, x.shape, dimension=2)
            x = jnp.where(col + k * thw < hw, x, 0.0)
        acc_ref[...] += jnp.sum(x, axis=-1)

    if needs_mask:
        @pl.when(k < nk - 1)
        def _body():
            _accum(False)

        @pl.when(k == nk - 1)
        def _tail():
            _accum(True)
    else:
        _accum(False)

    @pl.when(k == nk - 1)
    def _epilogue():
        out = jnp.dot(acc_ref[...], w_ref[...], preferred_element_type=jnp.float32)
        o_ref[...] = (out + b_ref[...]).astype(o_ref.dtype)


# ----------------------------- wrapper ------------------------------------ #


def classify_forward(x, weight, bias, *, x_tile_bytes=None):
    """Forward pass of `Classify` for a single NCHW tensor input.

    x:      (N, C1, H, W)
    weight: (C2, C1, 1, 1)   -- PyTorch Conv2d weight layout
    bias:   (C2,)
    returns (N, C2)
    """
    # TODO(synk): list-of-tensors input (channel-concat of pooled maps) not wired
    # through the kernel; the single-tensor path matches the common usage.
    n, c1, h, w = x.shape
    c2 = weight.shape[0]
    hw = h * w
    itemsize = jnp.dtype(x.dtype).itemsize

    x_flat = x.reshape(n, c1, hw)                                  # (N, C1, HW)

    # ---- hardware-aware budgets (v7x: 64 MiB VMEM, v5e/v6e: 128 MiB) ----
    vmem_cap = _vmem_capacity_bytes()
    if x_tile_bytes is None:
        # Allow ~55% of physical VMEM (capped) for the x stream; each x element
        # costs 2*itemsize (double-buffered block) plus a 4-byte f32 widen when
        # the input is sub-32-bit.
        x_vmem = min(int(vmem_cap * 0.55), 48 << 20)
        factor = 2 * itemsize + (4 if itemsize < 4 else 0)
        x_tile_bytes = max(4 << 20, (x_vmem * itemsize) // factor)

    plan, tn, chunk = _select_plan(n, c1, hw, itemsize, x_tile_bytes)

    # ---- weight/bias prep: fold 1/HW, pad C2 to lane-dense multiple of 128 ----
    c2p = max(128, _round_up(c2, 128))
    w_mat = (weight.reshape(c2, c1).T.astype(jnp.float32)) * (1.0 / hw)  # (C1, C2)
    w_mat = jnp.pad(w_mat, ((0, 0), (0, c2p - c2)))                      # (C1, C2p)
    if plan == "c1":
        c1_pad = _round_up(c1, chunk)
        w_mat = jnp.pad(w_mat, ((0, c1_pad - c1), (0, 0)))               # zero rows
    b_row = jnp.pad(bias.astype(jnp.float32).reshape(1, c2),
                    ((0, 0), (0, c2p - c2)))                             # (1, C2p)

    sublane = max(8, 32 // itemsize)
    c1_sub = _round_up(c1, sublane)
    lanes_hw = _round_up(hw, 128)

    def _const2(shape, single):
        # Resident (constant index_map) block; single-buffer it when requested.
        if single:
            return pl.BlockSpec(shape, lambda *_: (0, 0),
                                pipeline_mode=pl.Buffered(1))
        return pl.BlockSpec(shape, lambda *_: (0, 0))

    # ---- per-plan grid / specs / scratch / VMEM estimate ----
    if plan == "full":
        grid = (pl.cdiv(n, tn),)
        kernel = _classify_full_kernel
        x_spec = pl.BlockSpec((tn, c1, hw), lambda i: (i, 0, 0))
        w_spec = lambda single: _const2((c1, c2p), single)
        b_spec = lambda single: _const2((1, c2p), single)
        out_spec = pl.BlockSpec((tn, c2p), lambda i: (i, 0))
        scratch = []
        semantics = ("parallel",)
        x_block = tn * c1_sub * lanes_hw * itemsize
        widen = tn * _round_up(c1, 8) * lanes_hw * 4 if itemsize < 4 else 0
        est = (2 * x_block + widen
               + 2 * _round_up(c1, 8) * c2p * 4
               + 2 * 8 * c2p * 4
               + 2 * _round_up(tn, 8) * c2p * itemsize
               + _round_up(tn, 8) * _round_up(c1, 128) * 4)
    elif plan == "c1":
        tc1 = chunk
        c1_pad = w_mat.shape[0]
        grid = (pl.cdiv(n, tn), c1_pad // tc1)
        kernel = functools.partial(_classify_c1_kernel, c1=c1, tc1=tc1,
                                   needs_mask=(c1 % tc1 != 0))
        x_spec = pl.BlockSpec((tn, tc1, hw), lambda i, j: (i, j, 0))
        w_spec = lambda single: pl.BlockSpec((tc1, c2p), lambda i, j: (j, 0))
        b_spec = lambda single: _const2((1, c2p), single)
        out_spec = pl.BlockSpec((tn, c2p), lambda i, j: (i, 0))
        scratch = [pltpu.VMEM((tn, c2p), jnp.float32)]
        semantics = ("parallel", "arbitrary")
        x_block = tn * _round_up(tc1, sublane) * lanes_hw * itemsize
        widen = tn * _round_up(tc1, 8) * lanes_hw * 4 if itemsize < 4 else 0
        est = (2 * x_block + widen
               + 2 * _round_up(tc1, 8) * c2p * 4
               + 2 * 8 * c2p * 4
               + 2 * _round_up(tn, 8) * c2p * itemsize
               + _round_up(tn, 8) * c2p * 4)
    else:  # "hw"
        thw = chunk
        grid = (pl.cdiv(n, tn), pl.cdiv(hw, thw))
        kernel = functools.partial(_classify_hw_kernel, hw=hw, thw=thw,
                                   needs_mask=(hw % thw != 0))
        x_spec = pl.BlockSpec((tn, c1, thw), lambda i, k: (i, 0, k))
        w_spec = lambda single: _const2((c1, c2p), single)
        b_spec = lambda single: _const2((1, c2p), single)
        out_spec = pl.BlockSpec((tn, c2p), lambda i, k: (i, 0))
        scratch = [pltpu.VMEM((tn, c1), jnp.float32)]
        semantics = ("parallel", "arbitrary")
        x_block = tn * c1_sub * _round_up(thw, 128) * itemsize
        widen = tn * _round_up(c1, 8) * _round_up(thw, 128) * 4 if itemsize < 4 else 0
        est = (2 * x_block + widen
               + 2 * _round_up(c1, 8) * c2p * 4
               + 2 * 8 * c2p * 4
               + 2 * _round_up(tn, 8) * c2p * itemsize
               + _round_up(tn, 8) * _round_up(c1, 128) * 4)

    vmem_limit = int(min(max(est * 3 // 2 + (8 << 20), 24 << 20),
                         (vmem_cap * 4) // 5))

    try:
        cost = pl.CostEstimate(
            flops=2 * n * c1 * c2p + n * c1 * hw,
            transcendentals=0,
            bytes_accessed=(x_flat.size * itemsize + w_mat.size * 4
                            + b_row.size * 4 + n * c2p * itemsize))
    except Exception:
        cost = None

    out_shape = jax.ShapeDtypeStruct((n, c2p), x.dtype)

    def _run(single_buffer_resident):
        gs = pltpu.PrefetchScalarGridSpec(
            num_scalar_prefetch=0,
            grid=grid,
            in_specs=[x_spec,
                      w_spec(single_buffer_resident),
                      b_spec(single_buffer_resident)],
            out_specs=out_spec,
            scratch_shapes=scratch,
        )
        call = pl.pallas_call(
            kernel,
            out_shape=out_shape,
            grid_spec=gs,
            compiler_params=pltpu.CompilerParams(
                dimension_semantics=semantics,
                vmem_limit_bytes=vmem_limit,
            ),
            cost_estimate=cost,
        )
        return call(x_flat, w_mat, b_row)

    try:
        out_padded = _run(True)    # single-buffer the resident W/b blocks
    except Exception:
        out_padded = _run(False)   # safe fallback: default double buffering

    return out_padded[:, :c2]


# ------------------------------- test -------------------------------------- #


if __name__ == "__main__":
    key = jax.random.PRNGKey(0)

    def run_case(k, n, c1, hh, ww, c2, budget=None):
        kx, kw, kb = jax.random.split(k, 3)
        x = jax.random.normal(kx, (n, c1, hh, ww), dtype=jnp.float32)
        weight = jax.random.normal(kw, (c2, c1, 1, 1), dtype=jnp.float32) * 0.1
        bias = jax.random.normal(kb, (c2,), dtype=jnp.float32) * 0.1

        out = classify_forward(x, weight, bias, x_tile_bytes=budget)
        out = jax.block_until_ready(out)

        pooled = jnp.mean(x, axis=(2, 3))                    # (N, C1)
        ref = pooled @ weight.reshape(c2, c1).T + bias       # (N, C2)
        assert out.shape == (n, c2), out.shape
        assert jnp.allclose(out, ref, atol=1e-4, rtol=1e-4), \
            float(jnp.max(jnp.abs(out - ref)))

    k0, k1, k2 = jax.random.split(key, 3)
    # Main small case (module-typical shape); exercises the one-step "full" plan.
    run_case(k0, 2, 4, 16, 16, 8)
    # Tiny VMEM budgets force the chunked-C1 and chunked-HW streaming plans so
    # every code path is compile/run/correctness checked on-device.
    run_case(k1, 2, 20, 16, 16, 8, budget=40 * 1024)   # "c1" plan (partial C1 block)
    run_case(k2, 2, 20, 17, 17, 8, budget=8 * 1024)    # "hw" plan (masked tail chunk)

    print("KERNEL_OK")
</pallas_src>

<mosaic_0001>
module attributes {stable_mosaic.version = 11 : i64} {
  func.func @_classify_full_kernel(%arg0: i32, %arg1: memref<2x4x256xf32, #tpu.memory_space<vmem>>, %arg2: memref<4x128xf32, #tpu.memory_space<vmem>>, %arg3: memref<1x128xf32, #tpu.memory_space<vmem>>, %arg4: memref<2x128xf32, #tpu.memory_space<vmem>>) attributes {dimension_semantics = [#tpu.dimension_semantics<parallel>], iteration_bounds = array<i64: 1>, scalar_prefetch = 0 : i64, scratch_operands = 0 : i64, tpu.core_type = #tpu.core_type<tc>, window_params = [{transform_indices = @transform_0, window_bounds = array<i64: 2, 4, 256>}, {pipeline_mode = #tpu.pipeline_mode<synchronous>, transform_indices = @transform_1, window_bounds = array<i64: 4, 128>}, {pipeline_mode = #tpu.pipeline_mode<synchronous>, transform_indices = @transform_2, window_bounds = array<i64: 1, 128>}, {transform_indices = @transform_3, window_bounds = array<i64: 2, 128>}]} {
    %c0 = arith.constant 0 : index
    %c0_0 = arith.constant 0 : index
    %c0_1 = arith.constant 0 : index
    %0 = vector.load %arg1[%c0, %c0_0, %c0_1] : memref<2x4x256xf32, #tpu.memory_space<vmem>>, vector<2x4x256xf32>
    %cst = arith.constant dense<0.000000e+00> : vector<2x4xf32>
    %1 = vector.multi_reduction <add>, %0, %cst [2] : vector<2x4x256xf32> to vector<2x4xf32>
    %c0_2 = arith.constant 0 : index
    %c0_3 = arith.constant 0 : index
    %2 = vector.load %arg2[%c0_2, %c0_3] : memref<4x128xf32, #tpu.memory_space<vmem>>, vector<4x128xf32>
    %cst_4 = arith.constant dense<0.000000e+00> : vector<2x128xf32>
    %3 = tpu.matmul %1, %2, %cst_4 {dimension_numbers = #tpu.dot_dimension_numbers<[1], [0], [0], [1], [0, 0, 1, 1], [], []>} : vector<2x4xf32>, vector<4x128xf32>, vector<2x128xf32> -> vector<2x128xf32>
    %c0_5 = arith.constant 0 : index
    %c0_6 = arith.constant 0 : index
    %4 = vector.load %arg3[%c0_5, %c0_6] : memref<1x128xf32, #tpu.memory_space<vmem>>, vector<1x128xf32>
    %5 = vector.broadcast %4 : vector<1x128xf32> to vector<2x128xf32>
    %6 = arith.addf %3, %5 : vector<2x128xf32>
    %c0_7 = arith.constant 0 : index
    %c0_8 = arith.constant 0 : index
    %7 = vector.load %arg4[%c0_7, %c0_8] : memref<2x128xf32, #tpu.memory_space<vmem>>, vector<2x128xf32>
    tpu.vector_store %arg4[%c0_7, %c0_8], %6 {strides = array<i32>} : memref<2x128xf32, #tpu.memory_space<vmem>>, vector<2x128xf32>,
    return
  }
  func.func @transform_0(%arg0: i32) -> (i32, i32, i32) {
    %c0_i32 = arith.constant 0 : i32
    %c0_i32_0 = arith.constant 0 : i32
    %c0_i32_1 = arith.constant 0 : i32
    return %arg0, %c0_i32, %c0_i32_0 : i32, i32, i32
  }
  func.func @transform_1(%arg0: i32) -> (i32, i32) {
    %c0_i32 = arith.constant 0 : i32
    %c0_i32_0 = arith.constant 0 : i32
    %c0_i32_1 = arith.constant 0 : i32
    return %c0_i32, %c0_i32_0 : i32, i32
  }
  func.func @transform_2(%arg0: i32) -> (i32, i32) {
    %c0_i32 = arith.constant 0 : i32
    %c0_i32_0 = arith.constant 0 : i32
    %c0_i32_1 = arith.constant 0 : i32
    return %c0_i32, %c0_i32_0 : i32, i32
  }
  func.func @transform_3(%arg0: i32) -> (i32, i32) {
    %c0_i32 = arith.constant 0 : i32
    %c0_i32_0 = arith.constant 0 : i32
    return %arg0, %c0_i32 : i32, i32
  }
}

module attributes {stable_mosaic.version = 11 : i64} {
  func.func @_classify_full_kernel(%arg0: i32, %arg1: memref<2x4x256xf32, #tpu.memory_space<vmem>>, %arg2: memref<4x128xf32, #tpu.memory_space<vmem>>, %arg3: memref<1x128xf32, #tpu.memory_space<vmem>>, %arg4: memref<2x128xf32, #tpu.memory_space<vmem>>) attributes {dimension_semantics = [#tpu.dimension_semantics<parallel>], iteration_bounds = array<i64: 1>, scalar_prefetch = 0 : i64, scratch_operands = 0 : i64, tpu.core_type = #tpu.core_type<tc>, window_params = [{transform_indices = @transform_0, window_bounds = array<i64: 2, 4, 256>}, {pipeline_mode = #tpu.pipeline_mode<synchronous>, transform_indices = @transform_1, window_bounds = array<i64: 4, 128>}, {pipeline_mode = #tpu.pipeline_mode<synchronous>, transform_indices = @transform_2, window_bounds = array<i64: 1, 128>}, {transform_indices = @transform_3, window_bounds = array<i64: 2, 128>}]} {
    %c0 = arith.constant 0 : index
    %c0_0 = arith.constant 0 : index
    %c0_1 = arith.constant 0 : index
    %0 = vector.load %arg1[%c0, %c0_0, %c0_1] : memref<2x4x256xf32, #tpu.memory_space<vmem>>, vector<2x4x256xf32>
    %cst = arith.constant dense<0.000000e+00> : vector<2x4xf32>
    %1 = vector.multi_reduction <add>, %0, %cst [2] : vector<2x4x256xf32> to vector<2x4xf32>
    %c0_2 = arith.constant 0 : index
    %c0_3 = arith.constant 0 : index
    %2 = vector.load %arg2[%c0_2, %c0_3] : memref<4x128xf32, #tpu.memory_space<vmem>>, vector<4x128xf32>
    %cst_4 = arith.constant dense<0.000000e+00> : vector<2x128xf32>
    %3 = tpu.matmul %1, %2, %cst_4 {dimension_numbers = #tpu.dot_dimension_numbers<[1], [0], [0], [1], [0, 0, 1, 1], [], []>} : vector<2x4xf32>, vector<4x128xf32>, vector<2x128xf32> -> vector<2x128xf32>
    %c0_5 = arith.constant 0 : index
    %c0_6 = arith.constant 0 : index
    %4 = vector.load %arg3[%c0_5, %c0_6] : memref<1x128xf32, #tpu.memory_space<vmem>>, vector<1x128xf32>
    %5 = vector.broadcast %4 : vector<1x128xf32> to vector<2x128xf32>
    %6 = arith.addf %3, %5 : vector<2x128xf32>
    %c0_7 = arith.constant 0 : index
    %c0_8 = arith.constant 0 : index
    %7 = vector.load %arg4[%c0_7, %c0_8] : memref<2x128xf32, #tpu.memory_space<vmem>>, vector<2x128xf32>
    tpu.vector_store %arg4[%c0_7, %c0_8], %6 {strides = array<i32>} : memref<2x128xf32, #tpu.memory_space<vmem>>, vector<2x128xf32>,
    return
  }
  func.func @transform_0(%arg0: i32) -> (i32, i32, i32) {
    %c0_i32 = arith.constant 0 : i32
    %c0_i32_0 = arith.constant 0 : i32
    %c0_i32_1 = arith.constant 0 : i32
    return %arg0, %c0_i32, %c0_i32_0 : i32, i32, i32
  }
  func.func @transform_1(%arg0: i32) -> (i32, i32) {
    %c0_i32 = arith.constant 0 : i32
    %c0_i32_0 = arith.constant 0 : i32
    %c0_i32_1 = arith.constant 0 : i32
    return %c0_i32, %c0_i32_0 : i32, i32
  }
  func.func @transform_2(%arg0: i32) -> (i32, i32) {
    %c0_i32 = arith.constant 0 : i32
    %c0_i32_0 = arith.constant 0 : i32
    %c0_i32_1 = arith.constant 0 : i32
    return %c0_i32, %c0_i32_0 : i32, i32
  }
  func.func @transform_3(%arg0: i32) -> (i32, i32) {
    %c0_i32 = arith.constant 0 : i32
    %c0_i32_0 = arith.constant 0 : i32
    return %arg0, %c0_i32 : i32, i32
  }
}

</mosaic_0001>

<bundles_post_ra>
// kernel: tpu_custom_call.1
= control target key start
LH: loop header
LB: loop body
LE: loop exit
PB: predicated region body
PF: predicated region fallthrough
CT: control target
= control target key end

     0   :  { %8 = vsyncpa [#allocation3], 0  ;;  %s252_s0 = inlined_call_operand.hbm [shape: f32[2,4,256], index: 0, kind: input, shape index: {}]   ;;  %s253_s1 = inlined_call_operand.hbm [shape: f32[4,128], index: 1, kind: input, shape index: {}]   ;;  %s254_s2 = inlined_call_operand.vmem [shape: f32[1,128], index: 2, kind: input, shape index: {}]   ;;  %s255_s3 = inlined_call_operand.hbm [shape: f32[2,128], index: 3, kind: output, shape index: {}]  }
   0x1   :  { %9 = vsyncpa [#allocation6], 0 }
   0x2   :  { %10 = vsyncpa [#allocation4], 0  ;;  %s15_s14 = sshll.u32 %s252_s0, 4  ;;  %s215_s15 = smov [#allocation2]   ;;  %s16_s14 = int_to_ptr.hbm [resolvable:$true] %s15_s14 }
   0x3   :  { %s17_s16 = sshll.u32 %s215_s15, 4  ;;  %s29_s19 = sshll.u32 %s253_s1, 4  ;;  %s18_s16 = int_to_ptr.vmem [resolvable:$true] %s17_s16  ;;  %s30_s19 = int_to_ptr.hbm [resolvable:$true] %s29_s19 }
   0x4   :  { %s216_s20 = smov 128   ;;  %s217_s21 = smov 8  }
   0x5   :  { %23 = dma.hbm_to_vmem [thread:$0]  %s16_s14, 256, %s18_s16, [#allocation3], %s216_s20, %s216_s20, %s217_s21  }
   0x6   :  { %s218_s22 = smov [#allocation5]  }
   0x7   :  { %s31_s23 = sshll.u32 %s218_s22, 4  ;;  %s32_s23 = int_to_ptr.vmem [resolvable:$true] %s31_s23 }
   0x8   :  { %34 = dma.hbm_to_vmem [thread:$0]  %s30_s19, 64, %s32_s23, [#allocation6]  }
   0x9   :  { %209 = dma.done.wait [#allocation3], 256  }
   0xa   :  { %210 = vsyncadd [#allocation3], 4294967040 }
   0xb   :  { %211 = dma.done.wait [#allocation6], 64  }
   0xc   :  { %212 = vsyncadd [#allocation6], 4294967232  ;;  %v45_v0 = vld [vmem:[#allocation2] sm:$0xff]  ;;  %v46_v1 = vld [vmem:[#allocation2 + $0x8] sm:$0xff]  ;;  %vm60_vm0 = vcmask 1043456   ;;  %v78_v14 = vlaneseq  ;;  %vm82_vm1 = vcmask 1041409  }
   0xd   :  { %49 = vst [vmem:[#allocation1] ss:$2 sm:$0xff] %v45_v0  ;;  %v71_v12 = vld [vmem:[#allocation5] sm:$0xf]  ;;  %vm84_vm2 = vcmask 31744   ;;  %s219_s24 = smov [#allocation7]  }
   0xe   :  { %53 = vst [vmem:[#allocation1 + $0x10] ss:$2 sm:$0xff] %v46_v1  ;;  %129 = vmatpush.msk.msra.mxu0 %vm60_vm0, %v71_v12  ;;  %v79_v15 = vand.u32 127, %v78_v14  ;;  %v136_v20 = vld [vmem:[%s254_s2] ss:$0 sm:$0xff]  ;;  %s116_s25 = sshll.u32 %s219_s24, 4  ;;  %s117_s25 = int_to_ptr.vmem [resolvable:$true] %s116_s25 }
   0xf   :  { %s118_s28 = sshll.u32 %s255_s3, 4  ;;  %s119_s28 = int_to_ptr.hbm [resolvable:$true] %s118_s28 }
  0x14   :  { %v50_v2 = vld.sshfl [vmem:[#allocation1] sm:$0xff pattern:$0x75316420]  ;;  %v51_v3 = vld.sshfl [vmem:[#allocation1 + $0x8] sm:$0xff pattern:$0x75316420] }
  0x15   :  { %v61_v4 = vsel %vm60_vm0, %v50_v2, 0.0  ;;  %v62_v5 = vsel %vm60_vm0, %v51_v3, 0.0  ;;  %v54_v7 = vld.sshfl [vmem:[#allocation1 + $0x10] sm:$0xff pattern:$0x75316420] }
  0x16   :  { %v63_v6 = vadd.f32 %v62_v5, %v61_v4  ;;  %v55_v8 = vld.sshfl [vmem:[#allocation1 + $0x18] sm:$0xff pattern:$0x75316420]  ;;  %v66_v9 = vsel %vm60_vm0, %v54_v7, 0.0 }
  0x17   :  { %v67_v10 = vsel %vm60_vm0, %v55_v8, 0.0 }
  0x18   :  { %64 = vadd.xlane.f32.xlu0 %v63_v6  ;;  %v68_v11 = vadd.f32 %v67_v10, %v66_v9 }
  0x20   :  { %69 = vadd.xlane.f32.xlu0 %v68_v11 }
  0x8b   :  { %v65_v13 = vpop.xlane.xlu0 %64 }
  0x8c   :  { %v80_v17 = vperm.slane %v65_v13, %v79_v15 }
  0x93   :  { %v70_v16 = vpop.xlane.xlu0 %69 }
  0x94   :  { %v81_v18 = vperm.slane %v70_v16, %v79_v15 }
  0x96   :  { %v83_v19 = vsel %vm82_vm1, %v81_v18, %v80_v17 }
  0x97   :  { %130 = vmatmul.msk.f32.vlgmr.msra.gmra.mxu0 %vm84_vm2, %v83_v19 }
 0x114   :  { %v107_v21 = vpop.f32.mrf.mxu0 }
 0x115   :  { %v108_v22 = vadd.f32 %v136_v20, %v107_v21 }
 0x117   :  { %110 = vst [vmem:[#allocation7] sm:$0x3] %v108_v22 }
 0x118   :  { %121 = dma.vmem_to_hbm [thread:$0]  %s117_s25, 32, %s119_s28, [#allocation4]  }
 0x119   :  { %213 = dma.done.wait [#allocation4], 32  }
 0x11a   :  { %214 = vsyncadd [#allocation4], 4294967264 }
 0x11b   :  { %126 = vsyncpa [#allocation3], 1 }
 0x11c   :  { %127 = vsyncpa [#allocation6], 1 }
 0x11d   :  { %128 = vsyncpa [#allocation4], 1 }

// kernel: tpu_custom_call.1
= control target key start
LH: loop header
LB: loop body
LE: loop exit
PB: predicated region body
PF: predicated region fallthrough
CT: control target
= control target key end

     0   :  { %8 = vsyncpa [#allocation3], 0  ;;  %s252_s0 = inlined_call_operand.hbm [shape: f32[2,4,256], index: 0, kind: input, shape index: {}]   ;;  %s253_s1 = inlined_call_operand.hbm [shape: f32[4,128], index: 1, kind: input, shape index: {}]   ;;  %s254_s2 = inlined_call_operand.vmem [shape: f32[1,128], index: 2, kind: input, shape index: {}]   ;;  %s255_s3 = inlined_call_operand.hbm [shape: f32[2,128], index: 3, kind: output, shape index: {}]  }
   0x1   :  { %9 = vsyncpa [#allocation6], 0 }
   0x2   :  { %10 = vsyncpa [#allocation4], 0  ;;  %s15_s14 = sshll.u32 %s252_s0, 4  ;;  %s215_s15 = smov [#allocation2]   ;;  %s16_s14 = int_to_ptr.hbm [resolvable:$true] %s15_s14 }
   0x3   :  { %s17_s16 = sshll.u32 %s215_s15, 4  ;;  %s29_s19 = sshll.u32 %s253_s1, 4  ;;  %s18_s16 = int_to_ptr.vmem [resolvable:$true] %s17_s16  ;;  %s30_s19 = int_to_ptr.hbm [resolvable:$true] %s29_s19 }
   0x4   :  { %s216_s20 = smov 128   ;;  %s217_s21 = smov 8  }
   0x5   :  { %23 = dma.hbm_to_vmem [thread:$0]  %s16_s14, 256, %s18_s16, [#allocation3], %s216_s20, %s216_s20, %s217_s21  }
   0x6   :  { %s218_s22 = smov [#allocation5]  }
   0x7   :  { %s31_s23 = sshll.u32 %s218_s22, 4  ;;  %s32_s23 = int_to_ptr.vmem [resolvable:$true] %s31_s23 }
   0x8   :  { %34 = dma.hbm_to_vmem [thread:$0]  %s30_s19, 64, %s32_s23, [#allocation6]  }
   0x9   :  { %209 = dma.done.wait [#allocation3], 256  }
   0xa   :  { %210 = vsyncadd [#allocation3], 4294967040 }
   0xb   :  { %211 = dma.done.wait [#allocation6], 64  }
   0xc   :  { %212 = vsyncadd [#allocation6], 4294967232  ;;  %v45_v0 = vld [vmem:[#allocation2] sm:$0xff]  ;;  %v46_v1 = vld [vmem:[#allocation2 + $0x8] sm:$0xff]  ;;  %vm60_vm0 = vcmask 1043456   ;;  %v78_v14 = vlaneseq  ;;  %vm82_vm1 = vcmask 1041409  }
   0xd   :  { %49 = vst [vmem:[#allocation1] ss:$2 sm:$0xff] %v45_v0  ;;  %v71_v12 = vld [vmem:[#allocation5] sm:$0xf]  ;;  %vm84_vm2 = vcmask 31744   ;;  %s219_s24 = smov [#allocation7]  }
   0xe   :  { %53 = vst [vmem:[#allocation1 + $0x10] ss:$2 sm:$0xff] %v46_v1  ;;  %129 = vmatpush.msk.msra.mxu0 %vm60_vm0, %v71_v12  ;;  %v79_v15 = vand.u32 127, %v78_v14  ;;  %v136_v20 = vld [vmem:[%s254_s2] ss:$0 sm:$0xff]  ;;  %s116_s25 = sshll.u32 %s219_s24, 4  ;;  %s117_s25 = int_to_ptr.vmem [resolvable:$true] %s116_s25 }
   0xf   :  { %s118_s28 = sshll.u32 %s255_s3, 4  ;;  %s119_s28 = int_to_ptr.hbm [resolvable:$true] %s118_s28 }
  0x14   :  { %v50_v2 = vld.sshfl [vmem:[#allocation1] sm:$0xff pattern:$0x75316420]  ;;  %v51_v3 = vld.sshfl [vmem:[#allocation1 + $0x8] sm:$0xff pattern:$0x75316420] }
  0x15   :  { %v61_v4 = vsel %vm60_vm0, %v50_v2, 0.0  ;;  %v62_v5 = vsel %vm60_vm0, %v51_v3, 0.0  ;;  %v54_v7 = vld.sshfl [vmem:[#allocation1 + $0x10] sm:$0xff pattern:$0x75316420] }
  0x16   :  { %v63_v6 = vadd.f32 %v62_v5, %v61_v4  ;;  %v55_v8 = vld.sshfl [vmem:[#allocation1 + $0x18] sm:$0xff pattern:$0x75316420]  ;;  %v66_v9 = vsel %vm60_vm0, %v54_v7, 0.0 }
  0x17   :  { %v67_v10 = vsel %vm60_vm0, %v55_v8, 0.0 }
  0x18   :  { %64 = vadd.xlane.f32.xlu0 %v63_v6  ;;  %v68_v11 = vadd.f32 %v67_v10, %v66_v9 }
  0x20   :  { %69 = vadd.xlane.f32.xlu0 %v68_v11 }
  0x8b   :  { %v65_v13 = vpop.xlane.xlu0 %64 }
  0x8c   :  { %v80_v17 = vperm.slane %v65_v13, %v79_v15 }
  0x93   :  { %v70_v16 = vpop.xlane.xlu0 %69 }
  0x94   :  { %v81_v18 = vperm.slane %v70_v16, %v79_v15 }
  0x96   :  { %v83_v19 = vsel %vm82_vm1, %v81_v18, %v80_v17 }
  0x97   :  { %130 = vmatmul.msk.f32.vlgmr.msra.gmra.mxu0 %vm84_vm2, %v83_v19 }
 0x114   :  { %v107_v21 = vpop.f32.mrf.mxu0 }
 0x115   :  { %v108_v22 = vadd.f32 %v136_v20, %v107_v21 }
 0x117   :  { %110 = vst [vmem:[#allocation7] sm:$0x3] %v108_v22 }
 0x118   :  { %121 = dma.vmem_to_hbm [thread:$0]  %s117_s25, 32, %s119_s28, [#allocation4]  }
 0x119   :  { %213 = dma.done.wait [#allocation4], 32  }
 0x11a   :  { %214 = vsyncadd [#allocation4], 4294967264 }
 0x11b   :  { %126 = vsyncpa [#allocation3], 1 }
 0x11c   :  { %127 = vsyncpa [#allocation6], 1 }
 0x11d   :  { %128 = vsyncpa [#allocation4], 1 }

</bundles_post_ra>
